<compile_context>
chip_gen: v7x
topology: tpu7x:2x2x1
jax: 0.10.0
libtpu: 0.0.40
codegen_flags: <defaults>
</compile_context>

<pallas_src>
import functools
import math

import jax
import jax.numpy as jnp
from jax.experimental import pallas as pl
from jax.experimental.pallas import tpu as pltpu


def _round_up(x: int, m: int) -> int:
    return ((x + m - 1) // m) * m


def _relative_position_bucket(n, *, causal, num_buckets, max_distance):
    """Vectorized T5 bucket function.  `n` = -(relative_position) = q - k (int32).

    Shared by the kernel, the per-block bound precompute, and the reference, so
    all three use bit-identical formulas.
    """
    if not causal:
        num_buckets //= 2
        ret = jnp.where(n < 0, num_buckets, 0).astype(jnp.int32)
        n = jnp.abs(n)
    else:
        ret = jnp.zeros_like(n)
        n = jnp.maximum(n, 0)
    max_exact = num_buckets // 2
    is_small = n < max_exact
    # Clamp to >= 1 before log; those entries are masked by is_small anyway.
    n_f = jnp.maximum(n, 1).astype(jnp.float32)
    val_if_large = max_exact + (
        jnp.log(n_f / max_exact)
        / math.log(max_distance / max_exact)
        * (num_buckets - max_exact)
    ).astype(jnp.int32)                    # trunc-toward-zero == torch .long()
    val_if_large = jnp.minimum(val_if_large, num_buckets - 1)
    return ret + jnp.where(is_small, n, val_if_large)


def _feedback_position_kernel(lo_ref, hi_ref, emb_ref, out_ref, *,
                              num_buckets, max_distance, causal,
                              ti, tj, n_head):
    # lo_ref / hi_ref: (grid_i, grid_j) int32 in SMEM -- per-block bucket range.
    # emb_ref:         (num_buckets, n_head) f32 in SMEM (full table).
    # out_ref:         (n_head, ti, tj) VMEM output block (head-blocked).
    #
    # NOTE: program_id only at the top level (interpret-mode safe); only its
    # traced *values* are captured by the pl.when branches below.
    ib = pl.program_id(0)
    jb = pl.program_id(1)
    q0 = ib * ti
    k0 = jb * tj
    b_lo = lo_ref[ib, jb]
    b_hi = hi_ref[ib, jb]

    @pl.when(b_lo == b_hi)
    def _fill_uniform():
        # Whole tile maps to a single bucket (saturated, far-from-diagonal
        # region): skip the bucket math entirely -> pure lane-dense broadcast
        # store, memory bound.
        for h in range(n_head):
            out_ref[h, :, :] = jnp.full((ti, tj), emb_ref[b_lo, h],
                                        dtype=out_ref.dtype)

    @pl.when(b_lo != b_hi)
    def _general():
        q_pos = jax.lax.broadcasted_iota(jnp.int32, (ti, tj), 0) + q0
        k_pos = jax.lax.broadcasted_iota(jnp.int32, (ti, tj), 1) + k0
        bucket = _relative_position_bucket(
            q_pos - k_pos, causal=causal, num_buckets=num_buckets,
            max_distance=max_distance)

        for h in range(n_head):
            out_ref[h, :, :] = jnp.zeros((ti, tj), dtype=out_ref.dtype)

        def body(b, carry):
            eq = bucket == b                        # one compare, shared by heads
            for h in range(n_head):
                out_ref[h, :, :] = jnp.where(
                    eq, emb_ref[b, h], out_ref[h, :, :]).astype(out_ref.dtype)
            return carry

        # Visit only the buckets actually present in this tile.
        jax.lax.fori_loop(b_lo, b_hi + 1, body, 0)


def feedback_position_bias(qk_dots, emb_weight, *, num_buckets=32,
                           max_distance=128, causal=False,
                           block_i=256, block_j=1024, out_dtype=None):
    """Returns the relative position bias with shape (1, n_head, i, j)."""
    i, j = qk_dots.shape[-2], qk_dots.shape[-1]
    nb, n_head = emb_weight.shape
    assert nb == num_buckets
    out_dtype = jnp.float32 if out_dtype is None else out_dtype

    # Lane/sublane-dense output guard: pad i to a multiple of 8 and j to a
    # multiple of 128 (unless smaller than one vreg dim), slice back after.
    i_pad = i if i < 8 else _round_up(i, 8)
    j_pad = j if j < 128 else _round_up(j, 128)

    # Tile sizes: lane-dense, and auto-shrunk so one head-blocked output
    # buffer stays <= ~2 MiB (double-buffered 4 MiB + in-kernel temporaries
    # fits v5e's 16 MiB scoped-VMEM default; v6e/v7x have more headroom).
    ti = min(i_pad, max(8, _round_up(block_i, 8)))
    tj = min(j_pad, max(128, _round_up(block_j, 128)))
    budget = 2 << 20
    while ti > 8 and n_head * ti * tj * 4 > budget:
        ti = max(8, _round_up(ti // 2, 8))
    while tj > 128 and n_head * ti * tj * 4 > budget:
        tj = max(128, _round_up(tj // 2, 128))

    grid_i = pl.cdiv(i_pad, ti)
    grid_j = pl.cdiv(j_pad, tj)

    # Per-block bucket range [b_lo, b_hi] (tiny O(grid) computation).  The
    # bucket function of n is monotone on n >= 0 and on n <= -1, so its
    # extremes over a block's n-range lie at the range endpoints and at the
    # breakpoints n = -1 / n = 0 (clipped into range when outside).
    q0 = jnp.arange(grid_i, dtype=jnp.int32)[:, None] * ti
    k0 = jnp.arange(grid_j, dtype=jnp.int32)[None, :] * tj
    n_lo = q0 - (k0 + (tj - 1))
    n_hi = (q0 + (ti - 1)) - k0

    def _bkt(n):
        return _relative_position_bucket(n, causal=causal,
                                         num_buckets=num_buckets,
                                         max_distance=max_distance)

    cands = jnp.stack([
        _bkt(n_lo),
        _bkt(n_hi),
        _bkt(jnp.clip(jnp.zeros_like(n_lo), n_lo, n_hi)),
        _bkt(jnp.clip(jnp.full_like(n_lo, -1), n_lo, n_hi)),
    ])
    b_lo = cands.min(axis=0).astype(jnp.int32)
    b_hi = cands.max(axis=0).astype(jnp.int32)

    kernel = functools.partial(
        _feedback_position_kernel,
        num_buckets=num_buckets, max_distance=max_distance, causal=causal,
        ti=ti, tj=tj, n_head=n_head)

    out = pl.pallas_call(
        kernel,
        out_shape=jax.ShapeDtypeStruct((n_head, i_pad, j_pad), out_dtype),
        grid=(grid_i, grid_j),
        in_specs=[
            pl.BlockSpec(memory_space=pltpu.MemorySpace.SMEM),   # b_lo table
            pl.BlockSpec(memory_space=pltpu.MemorySpace.SMEM),   # b_hi table
            pl.BlockSpec(memory_space=pltpu.MemorySpace.SMEM),   # embedding
        ],
        out_specs=pl.BlockSpec((n_head, ti, tj), lambda ib, jb: (0, ib, jb)),
        compiler_params=pltpu.CompilerParams(
            dimension_semantics=("parallel", "parallel")),
    )(b_lo, b_hi, emb_weight.astype(jnp.float32))

    if (i_pad, j_pad) != (i, j):
        out = out[:, :i, :j]
    # (n_head, i, j) -> (1, n_head, i, j); no transpose needed.
    return out[None]


def _reference_bias(qk_dots, emb_weight, *, num_buckets=32, max_distance=128,
                    causal=False):
    """Pure-JAX reference mirroring the PyTorch forward, for verification."""
    i, j = qk_dots.shape[-2], qk_dots.shape[-1]
    q_pos = jnp.arange(i, dtype=jnp.int32)
    k_pos = jnp.arange(j, dtype=jnp.int32)
    rel_pos = k_pos[None, :] - q_pos[:, None]
    bucket = _relative_position_bucket(-rel_pos, causal=causal,
                                       num_buckets=num_buckets,
                                       max_distance=max_distance)
    values = emb_weight[bucket]                  # (i, j, h)
    return jnp.transpose(values, (2, 0, 1))[None]


if __name__ == "__main__":
    key = jax.random.PRNGKey(0)
    k_emb, k_x = jax.random.split(key)

    n_head = 4
    num_buckets = 32
    max_distance = 128

    # nn.Embedding(num_buckets, n_head) weight, N(0, 1) init (deterministic).
    emb_weight = jax.random.normal(k_emb, (num_buckets, n_head),
                                   dtype=jnp.float32)

    # --- Test 1: non-causal, tiny single tile (i = j = 16). ----------------
    batch, i, j = 2, 16, 16
    qk_dots = jax.random.normal(k_x, (batch, n_head, i, j), dtype=jnp.float32)
    bias = feedback_position_bias(qk_dots, emb_weight,
                                  num_buckets=num_buckets,
                                  max_distance=max_distance, causal=False)
    bias = jax.block_until_ready(bias)
    ref = _reference_bias(qk_dots, emb_weight, num_buckets=num_buckets,
                          max_distance=max_distance, causal=False)
    assert bias.shape == (1, n_head, i, j), bias.shape
    assert jnp.allclose(bias, ref, atol=1e-6, rtol=1e-6), "mismatch (test 1)"

    # --- Test 2: causal, forced small tiles -> multi-block grid, exercises
    # both the uniform-bucket fast path and the bounded select loop. ---------
    i2, j2 = 16, 256
    qk2 = jax.random.normal(k_x, (batch, n_head, i2, j2), dtype=jnp.float32)
    bias2 = feedback_position_bias(qk2, emb_weight, num_buckets=num_buckets,
                                   max_distance=max_distance, causal=True,
                                   block_i=8, block_j=128)
    bias2 = jax.block_until_ready(bias2)
    ref2 = _reference_bias(qk2, emb_weight, num_buckets=num_buckets,
                           max_distance=max_distance, causal=True)
    assert bias2.shape == (1, n_head, i2, j2), bias2.shape
    assert jnp.allclose(bias2, ref2, atol=1e-6, rtol=1e-6), "mismatch (test 2)"

    # --- Test 3: non-causal, ragged shape -> lane padding, slice-back, and a
    # partial edge block along i. --------------------------------------------
    i3, j3 = 200, 200
    qk3 = jax.random.normal(k_x, (batch, n_head, i3, j3), dtype=jnp.float32)
    bias3 = feedback_position_bias(qk3, emb_weight, num_buckets=num_buckets,
                                   max_distance=max_distance, causal=False,
                                   block_i=64, block_j=128)
    bias3 = jax.block_until_ready(bias3)
    ref3 = _reference_bias(qk3, emb_weight, num_buckets=num_buckets,
                           max_distance=max_distance, causal=False)
    assert bias3.shape == (1, n_head, i3, j3), bias3.shape
    assert jnp.allclose(bias3, ref3, atol=1e-6, rtol=1e-6), "mismatch (test 3)"

    print("KERNEL_OK")
</pallas_src>

<mosaic_0001>
module attributes {stable_mosaic.version = 11 : i64} {
  func.func @_feedback_position_kernel(%arg0: i32, %arg1: i32, %arg2: memref<1x1xi32, #tpu.memory_space<smem>>, %arg3: memref<1x1xi32, #tpu.memory_space<smem>>, %arg4: memref<32x4xf32, #tpu.memory_space<smem>>, %arg5: memref<4x16x16xf32, #tpu.memory_space<vmem>>) attributes {dimension_semantics = [#tpu.dimension_semantics<parallel>, #tpu.dimension_semantics<parallel>], iteration_bounds = array<i64: 1, 1>, scalar_prefetch = 0 : i64, scratch_operands = 0 : i64, tpu.core_type = #tpu.core_type<tc>, window_params = [{transform_indices = @transform_0, window_bounds = array<i64: 1, 1>}, {transform_indices = @transform_1, window_bounds = array<i64: 1, 1>}, {transform_indices = @transform_2, window_bounds = array<i64: 32, 4>}, {transform_indices = @transform_3, window_bounds = array<i64: 4, 16, 16>}]} {
    %c16_i32 = arith.constant 16 : i32
    %0 = arith.muli %arg0, %c16_i32 : i32
    %c16_i32_0 = arith.constant 16 : i32
    %1 = arith.muli %arg1, %c16_i32_0 : i32
    %2 = arith.index_cast %arg0 : i32 to index
    %3 = arith.index_cast %arg1 : i32 to index
    %4 = memref.load %arg2[%2, %3] : memref<1x1xi32, #tpu.memory_space<smem>>
    %5 = arith.index_cast %arg0 : i32 to index
    %6 = arith.index_cast %arg1 : i32 to index
    %7 = memref.load %arg3[%5, %6] : memref<1x1xi32, #tpu.memory_space<smem>>
    %8 = arith.cmpi eq, %4, %7 : i32
    %9 = arith.extui %8 : i1 to i32
    %c0_i32 = arith.constant 0 : i32
    %10 = arith.cmpi ne, %9, %c0_i32 : i32
    scf.if %10 {
      %14 = arith.index_cast %4 : i32 to index
      %c0 = arith.constant 0 : index
      %15 = memref.load %arg4[%14, %c0] : memref<32x4xf32, #tpu.memory_space<smem>>
      %16 = vector.broadcast %15 : f32 to vector<16x16xf32>
      %c0_2 = arith.constant 0 : index
      %c0_3 = arith.constant 0 : index
      %c0_4 = arith.constant 0 : index
      %17 = vector.load %arg5[%c0_2, %c0_3, %c0_4] : memref<4x16x16xf32, #tpu.memory_space<vmem>>, vector<1x16x16xf32>
      %18 = vector.shape_cast %17 : vector<1x16x16xf32> to vector<16x16xf32>
      %19 = vector.shape_cast %16 : vector<16x16xf32> to vector<1x16x16xf32>
      tpu.vector_store %arg5[%c0_2, %c0_3, %c0_4], %19 {strides = array<i32>} : memref<4x16x16xf32, #tpu.memory_space<vmem>>, vector<1x16x16xf32>,
      %20 = arith.index_cast %4 : i32 to index
      %c1 = arith.constant 1 : index
      %21 = memref.load %arg4[%20, %c1] : memref<32x4xf32, #tpu.memory_space<smem>>
      %22 = vector.broadcast %21 : f32 to vector<16x16xf32>
      %c1_5 = arith.constant 1 : index
      %c0_6 = arith.constant 0 : index
      %c0_7 = arith.constant 0 : index
      %23 = vector.load %arg5[%c1_5, %c0_6, %c0_7] : memref<4x16x16xf32, #tpu.memory_space<vmem>>, vector<1x16x16xf32>
      %24 = vector.shape_cast %23 : vector<1x16x16xf32> to vector<16x16xf32>
      %25 = vector.shape_cast %22 : vector<16x16xf32> to vector<1x16x16xf32>
      tpu.vector_store %arg5[%c1_5, %c0_6, %c0_7], %25 {strides = array<i32>} : memref<4x16x16xf32, #tpu.memory_space<vmem>>, vector<1x16x16xf32>,
      %26 = arith.index_cast %4 : i32 to index
      %c2 = arith.constant 2 : index
      %27 = memref.load %arg4[%26, %c2] : memref<32x4xf32, #tpu.memory_space<smem>>
      %28 = vector.broadcast %27 : f32 to vector<16x16xf32>
      %c2_8 = arith.constant 2 : index
      %c0_9 = arith.constant 0 : index
      %c0_10 = arith.constant 0 : index
      %29 = vector.load %arg5[%c2_8, %c0_9, %c0_10] : memref<4x16x16xf32, #tpu.memory_space<vmem>>, vector<1x16x16xf32>
      %30 = vector.shape_cast %29 : vector<1x16x16xf32> to vector<16x16xf32>
      %31 = vector.shape_cast %28 : vector<16x16xf32> to vector<1x16x16xf32>
      tpu.vector_store %arg5[%c2_8, %c0_9, %c0_10], %31 {strides = array<i32>} : memref<4x16x16xf32, #tpu.memory_space<vmem>>, vector<1x16x16xf32>,
      %32 = arith.index_cast %4 : i32 to index
      %c3 = arith.constant 3 : index
      %33 = memref.load %arg4[%32, %c3] : memref<32x4xf32, #tpu.memory_space<smem>>
      %34 = vector.broadcast %33 : f32 to vector<16x16xf32>
      %c3_11 = arith.constant 3 : index
      %c0_12 = arith.constant 0 : index
      %c0_13 = arith.constant 0 : index
      %35 = vector.load %arg5[%c3_11, %c0_12, %c0_13] : memref<4x16x16xf32, #tpu.memory_space<vmem>>, vector<1x16x16xf32>
      %36 = vector.shape_cast %35 : vector<1x16x16xf32> to vector<16x16xf32>
      %37 = vector.shape_cast %34 : vector<16x16xf32> to vector<1x16x16xf32>
      tpu.vector_store %arg5[%c3_11, %c0_12, %c0_13], %37 {strides = array<i32>} : memref<4x16x16xf32, #tpu.memory_space<vmem>>, vector<1x16x16xf32>,
    } else {
    }
    %11 = arith.cmpi ne, %4, %7 : i32
    %12 = arith.extui %11 : i1 to i32
    %c0_i32_1 = arith.constant 0 : i32
    %13 = arith.cmpi ne, %12, %c0_i32_1 : i32
    scf.if %13 {
      %14 = tpu.iota {dimensions = array<i32: 0>} : vector<16x16xi32>
      %15 = vector.broadcast %0 : i32 to vector<16x16xi32>
      %16 = arith.addi %14, %15 : vector<16x16xi32>
      %17 = tpu.iota {dimensions = array<i32: 1>} : vector<16x16xi32>
      %18 = vector.broadcast %1 : i32 to vector<16x16xi32>
      %19 = arith.addi %17, %18 : vector<16x16xi32>
      %20 = arith.subi %16, %19 : vector<16x16xi32>
      %c0_i32_2 = arith.constant 0 : i32
      %21 = vector.broadcast %c0_i32_2 : i32 to vector<16x16xi32>
      %22 = arith.cmpi slt, %20, %21 : vector<16x16xi32>
      %c16_i32_3 = arith.constant 16 : i32
      %c0_i32_4 = arith.constant 0 : i32
      %23 = vector.broadcast %c16_i32_3 : i32 to vector<16x16xi32>
      %24 = vector.broadcast %c0_i32_4 : i32 to vector<16x16xi32>
      %25 = arith.select %22, %23, %24 : vector<16x16xi1>, vector<16x16xi32>
      %26 = math.absi %20 : vector<16x16xi32>
      %c8_i32 = arith.constant 8 : i32
      %27 = vector.broadcast %c8_i32 : i32 to vector<16x16xi32>
      %28 = arith.cmpi slt, %26, %27 : vector<16x16xi32>
      %c1_i32 = arith.constant 1 : i32
      %29 = vector.broadcast %c1_i32 : i32 to vector<16x16xi32>
      %30 = arith.maxsi %26, %29 : vector<16x16xi32>
      %31 = arith.sitofp %30 : vector<16x16xi32> to vector<16x16xf32>
      %cst = arith.constant 8.000000e+00 : f32
      %32 = vector.broadcast %cst : f32 to vector<16x16xf32>
      %33 = arith.divf %31, %32 : vector<16x16xf32>
      %34 = math.log %33 : vector<16x16xf32>
      %cst_5 = arith.constant 2.77258873 : f32
      %35 = vector.broadcast %cst_5 : f32 to vector<16x16xf32>
      %36 = arith.divf %34, %35 : vector<16x16xf32>
      %cst_6 = arith.constant 8.000000e+00 : f32
      %37 = vector.broadcast %cst_6 : f32 to vector<16x16xf32>
      %38 = arith.mulf %36, %37 : vector<16x16xf32>
      %39 = arith.fptosi %38 : vector<16x16xf32> to vector<16x16xi32>
      %c8_i32_7 = arith.constant 8 : i32
      %40 = vector.broadcast %c8_i32_7 : i32 to vector<16x16xi32>
      %41 = arith.addi %40, %39 : vector<16x16xi32>
      %c15_i32 = arith.constant 15 : i32
      %42 = vector.broadcast %c15_i32 : i32 to vector<16x16xi32>
      %43 = arith.minsi %41, %42 : vector<16x16xi32>
      %44 = arith.select %28, %26, %43 : vector<16x16xi1>, vector<16x16xi32>
      %45 = arith.addi %25, %44 : vector<16x16xi32>
      %cst_8 = arith.constant 0.000000e+00 : f32
      %46 = vector.broadcast %cst_8 : f32 to vector<16x16xf32>
      %c0 = arith.constant 0 : index
      %c0_9 = arith.constant 0 : index
      %c0_10 = arith.constant 0 : index
      %47 = vector.load %arg5[%c0, %c0_9, %c0_10] : memref<4x16x16xf32, #tpu.memory_space<vmem>>, vector<1x16x16xf32>
      %48 = vector.shape_cast %47 : vector<1x16x16xf32> to vector<16x16xf32>
      %49 = vector.shape_cast %46 : vector<16x16xf32> to vector<1x16x16xf32>
      tpu.vector_store %arg5[%c0, %c0_9, %c0_10], %49 {strides = array<i32>} : memref<4x16x16xf32, #tpu.memory_space<vmem>>, vector<1x16x16xf32>,
      %cst_11 = arith.constant 0.000000e+00 : f32
      %50 = vector.broadcast %cst_11 : f32 to vector<16x16xf32>
      %c1 = arith.constant 1 : index
      %c0_12 = arith.constant 0 : index
      %c0_13 = arith.constant 0 : index
      %51 = vector.load %arg5[%c1, %c0_12, %c0_13] : memref<4x16x16xf32, #tpu.memory_space<vmem>>, vector<1x16x16xf32>
      %52 = vector.shape_cast %51 : vector<1x16x16xf32> to vector<16x16xf32>
      %53 = vector.shape_cast %50 : vector<16x16xf32> to vector<1x16x16xf32>
      tpu.vector_store %arg5[%c1, %c0_12, %c0_13], %53 {strides = array<i32>} : memref<4x16x16xf32, #tpu.memory_space<vmem>>, vector<1x16x16xf32>,
      %cst_14 = arith.constant 0.000000e+00 : f32
      %54 = vector.broadcast %cst_14 : f32 to vector<16x16xf32>
      %c2 = arith.constant 2 : index
      %c0_15 = arith.constant 0 : index
      %c0_16 = arith.constant 0 : index
      %55 = vector.load %arg5[%c2, %c0_15, %c0_16] : memref<4x16x16xf32, #tpu.memory_space<vmem>>, vector<1x16x16xf32>
      %56 = vector.shape_cast %55 : vector<1x16x16xf32> to vector<16x16xf32>
      %57 = vector.shape_cast %54 : vector<16x16xf32> to vector<1x16x16xf32>
      tpu.vector_store %arg5[%c2, %c0_15, %c0_16], %57 {strides = array<i32>} : memref<4x16x16xf32, #tpu.memory_space<vmem>>, vector<1x16x16xf32>,
      %cst_17 = arith.constant 0.000000e+00 : f32
      %58 = vector.broadcast %cst_17 : f32 to vector<16x16xf32>
      %c3 = arith.constant 3 : index
      %c0_18 = arith.constant 0 : index
      %c0_19 = arith.constant 0 : index
      %59 = vector.load %arg5[%c3, %c0_18, %c0_19] : memref<4x16x16xf32, #tpu.memory_space<vmem>>, vector<1x16x16xf32>
      %60 = vector.shape_cast %59 : vector<1x16x16xf32> to vector<16x16xf32>
      %61 = vector.shape_cast %58 : vector<16x16xf32> to vector<1x16x16xf32>
      tpu.vector_store %arg5[%c3, %c0_18, %c0_19], %61 {strides = array<i32>} : memref<4x16x16xf32, #tpu.memory_space<vmem>>, vector<1x16x16xf32>,
      %c1_i32_20 = arith.constant 1 : i32
      %62 = arith.addi %7, %c1_i32_20 : i32
      %c0_i32_21 = arith.constant 0 : i32
      %63 = arith.subi %62, %4 : i32
      %64 = arith.addi %4, %63 : i32
      %c1_i32_22 = arith.constant 1 : i32
      scf.for %arg6 = %4 to %64 step %c1_i32_22  : i32 {
        %65 = vector.broadcast %arg6 : i32 to vector<16x16xi32>
        %66 = arith.cmpi eq, %45, %65 : vector<16x16xi32>
        %67 = arith.index_cast %arg6 : i32 to index
        %c0_23 = arith.constant 0 : index
        %68 = memref.load %arg4[%67, %c0_23] : memref<32x4xf32, #tpu.memory_space<smem>>
        %c0_24 = arith.constant 0 : index
        %c0_25 = arith.constant 0 : index
        %c0_26 = arith.constant 0 : index
        %69 = vector.load %arg5[%c0_24, %c0_25, %c0_26] : memref<4x16x16xf32, #tpu.memory_space<vmem>>, vector<1x16x16xf32>
        %70 = vector.shape_cast %69 : vector<1x16x16xf32> to vector<16x16xf32>
        %71 = vector.broadcast %68 : f32 to vector<16x16xf32>
        %72 = arith.select %66, %71, %70 : vector<16x16xi1>, vector<16x16xf32>
        %c0_27 = arith.constant 0 : index
        %c0_28 = arith.constant 0 : index
        %c0_29 = arith.constant 0 : index
        %73 = vector.load %arg5[%c0_27, %c0_28, %c0_29] : memref<4x16x16xf32, #tpu.memory_space<vmem>>, vector<1x16x16xf32>
        %74 = vector.shape_cast %73 : vector<1x16x16xf32> to vector<16x16xf32>
        %75 = vector.shape_cast %72 : vector<16x16xf32> to vector<1x16x16xf32>
        tpu.vector_store %arg5[%c0_27, %c0_28, %c0_29], %75 {strides = array<i32>} : memref<4x16x16xf32, #tpu.memory_space<vmem>>, vector<1x16x16xf32>,
        %76 = arith.index_cast %arg6 : i32 to index
        %c1_30 = arith.constant 1 : index
        %77 = memref.load %arg4[%76, %c1_30] : memref<32x4xf32, #tpu.memory_space<smem>>
        %c1_31 = arith.constant 1 : index
        %c0_32 = arith.constant 0 : index
        %c0_33 = arith.constant 0 : index
        %78 = vector.load %arg5[%c1_31, %c0_32, %c0_33] : memref<4x16x16xf32, #tpu.memory_space<vmem>>, vector<1x16x16xf32>
        %79 = vector.shape_cast %78 : vector<1x16x16xf32> to vector<16x16xf32>
        %80 = vector.broadcast %77 : f32 to vector<16x16xf32>
        %81 = arith.select %66, %80, %79 : vector<16x16xi1>, vector<16x16xf32>
        %c1_34 = arith.constant 1 : index
        %c0_35 = arith.constant 0 : index
        %c0_36 = arith.constant 0 : index
        %82 = vector.load %arg5[%c1_34, %c0_35, %c0_36] : memref<4x16x16xf32, #tpu.memory_space<vmem>>, vector<1x16x16xf32>
        %83 = vector.shape_cast %82 : vector<1x16x16xf32> to vector<16x16xf32>
        %84 = vector.shape_cast %81 : vector<16x16xf32> to vector<1x16x16xf32>
        tpu.vector_store %arg5[%c1_34, %c0_35, %c0_36], %84 {strides = array<i32>} : memref<4x16x16xf32, #tpu.memory_space<vmem>>, vector<1x16x16xf32>,
        %85 = arith.index_cast %arg6 : i32 to index
        %c2_37 = arith.constant 2 : index
        %86 = memref.load %arg4[%85, %c2_37] : memref<32x4xf32, #tpu.memory_space<smem>>
        %c2_38 = arith.constant 2 : index
        %c0_39 = arith.constant 0 : index
        %c0_40 = arith.constant 0 : index
        %87 = vector.load %arg5[%c2_38, %c0_39, %c0_40] : memref<4x16x16xf32, #tpu.memory_space<vmem>>, vector<1x16x16xf32>
        %88 = vector.shape_cast %87 : vector<1x16x16xf32> to vector<16x16xf32>
        %89 = vector.broadcast %86 : f32 to vector<16x16xf32>
        %90 = arith.select %66, %89, %88 : vector<16x16xi1>, vector<16x16xf32>
        %c2_41 = arith.constant 2 : index
        %c0_42 = arith.constant 0 : index
        %c0_43 = arith.constant 0 : index
        %91 = vector.load %arg5[%c2_41, %c0_42, %c0_43] : memref<4x16x16xf32, #tpu.memory_space<vmem>>, vector<1x16x16xf32>
        %92 = vector.shape_cast %91 : vector<1x16x16xf32> to vector<16x16xf32>
        %93 = vector.shape_cast %90 : vector<16x16xf32> to vector<1x16x16xf32>
        tpu.vector_store %arg5[%c2_41, %c0_42, %c0_43], %93 {strides = array<i32>} : memref<4x16x16xf32, #tpu.memory_space<vmem>>, vector<1x16x16xf32>,
        %94 = arith.index_cast %arg6 : i32 to index
        %c3_44 = arith.constant 3 : index
        %95 = memref.load %arg4[%94, %c3_44] : memref<32x4xf32, #tpu.memory_space<smem>>
        %c3_45 = arith.constant 3 : index
        %c0_46 = arith.constant 0 : index
        %c0_47 = arith.constant 0 : index
        %96 = vector.load %arg5[%c3_45, %c0_46, %c0_47] : memref<4x16x16xf32, #tpu.memory_space<vmem>>, vector<1x16x16xf32>
        %97 = vector.shape_cast %96 : vector<1x16x16xf32> to vector<16x16xf32>
        %98 = vector.broadcast %95 : f32 to vector<16x16xf32>
        %99 = arith.select %66, %98, %97 : vector<16x16xi1>, vector<16x16xf32>
        %c3_48 = arith.constant 3 : index
        %c0_49 = arith.constant 0 : index
        %c0_50 = arith.constant 0 : index
        %100 = vector.load %arg5[%c3_48, %c0_49, %c0_50] : memref<4x16x16xf32, #tpu.memory_space<vmem>>, vector<1x16x16xf32>
        %101 = vector.shape_cast %100 : vector<1x16x16xf32> to vector<16x16xf32>
        %102 = vector.shape_cast %99 : vector<16x16xf32> to vector<1x16x16xf32>
        tpu.vector_store %arg5[%c3_48, %c0_49, %c0_50], %102 {strides = array<i32>} : memref<4x16x16xf32, #tpu.memory_space<vmem>>, vector<1x16x16xf32>,
      }
    } else {
    }
    return
  }
  func.func @transform_0(%arg0: i32, %arg1: i32) -> (i32, i32) {
    %c0_i32 = arith.constant 0 : i32
    %c0_i32_0 = arith.constant 0 : i32
    %c0_i32_1 = arith.constant 0 : i32
    return %c0_i32, %c0_i32_0 : i32, i32
  }
  func.func @transform_1(%arg0: i32, %arg1: i32) -> (i32, i32) {
    %c0_i32 = arith.constant 0 : i32
    %c0_i32_0 = arith.constant 0 : i32
    %c0_i32_1 = arith.constant 0 : i32
    return %c0_i32, %c0_i32_0 : i32, i32
  }
  func.func @transform_2(%arg0: i32, %arg1: i32) -> (i32, i32) {
    %c0_i32 = arith.constant 0 : i32
    %c0_i32_0 = arith.constant 0 : i32
    %c0_i32_1 = arith.constant 0 : i32
    return %c0_i32, %c0_i32_0 : i32, i32
  }
  func.func @transform_3(%arg0: i32, %arg1: i32) -> (i32, i32, i32) {
    %c0_i32 = arith.constant 0 : i32
    %c0_i32_0 = arith.constant 0 : i32
    return %c0_i32, %arg0, %arg1 : i32, i32, i32
  }
}

</mosaic_0001>

<bundles_post_ra>
// kernel: tpu_custom_call.1
= control target key start
LH: loop header
LB: loop body
LE: loop exit
PB: predicated region body
PF: predicated region fallthrough
CT: control target
= control target key end

     0   :  { %10 = vsyncpa [#allocation6], 0  ;;  %s406_s0 = inlined_call_operand.<no memory space> [shape: s32[1,1], index: 0, kind: input, shape index: {}]   ;;  %s407_s1 = inlined_call_operand.<no memory space> [shape: s32[1,1], index: 1, kind: input, shape index: {}]   ;;  %s408_s2 = inlined_call_operand.vmem [shape: f32[32,4], index: 2, kind: input, shape index: {}]   ;;  %s409_s3 = inlined_call_operand.hbm [shape: f32[4,16,16], index: 3, kind: output, shape index: {}]  }
   0x1   :  { %11 = vsyncpa [#allocation5], 0  ;;  %s21_s14 = sshll.u32 %s408_s2, 4  ;;  %s22_s14 = int_to_ptr.vmem [resolvable:$true] %s21_s14 }
   0x2   :  { %s231_s15 = scalar_lea.vmem %s22_s14, 512  ;;  %p236_p1 = scmp.lt.s32.totalorder %s22_s14, %s22_s14 }
   0x3   :  { %p232_p0 = scmp.ne.s32.totalorder %s22_s14, %s231_s15  ;;  %p237_p2 = scmp.lt.s32.totalorder %s231_s15, %s231_s15 }
   0x5   :  { %p238_p3 = por %p237_p2, %p236_p1 }
   0x7   :  { %p239_p4 = pnand %p238_p3, %p232_p0 }
   0x9   :  { %242 = shalt.err (!%p239_p4)
}
   0xa   :  { %s277_s16 = smov [#allocation4]   ;;  %s278_s17 = smov 128  }
   0xb   :  { %s279_s18 = smov 8  }
   0xc   :  { %27 = dma.vmem_to_smem %s22_s14, 512, %s277_s16, [#allocation6], %s278_s17, %s278_s17, %s279_s18  }
   0xd   :  { %269 = dma.done.wait [#allocation6], 512  }
   0xe   :  { %270 = vsyncadd [#allocation6], 4294966784 }
   0xf   :  { %31 = sfence }
  0x10   :  { %p203_p5 = scmp.ne.s32.totalorder %s406_s0, %s407_s1 }
  0x11   :  { %s204_s24 = sshll.u32 (!%p203_p5), %s406_s0, 7  ;;  %vm46_vm0 = vcmask (!%p203_p5), 130048  }
  0x12   :  { %42 = sbr.rel (%p203_p5) target bundleno = 30 (0x1e), region = 21  ;;  %s44_s25 = sld [smem:[#allocation4 + %s204_s24]] (!%p203_p5) }
  0x13   :  { %s49_s26 = sadd.s32 (!%p203_p5), 1, %s204_s24  ;;  %s55_s28 = sadd.s32 (!%p203_p5), 2, %s204_s24 }
  0x14   :  { %s50_s27 = sld [smem:[#allocation4 + %s49_s26]] (!%p203_p5)  ;;  %s61_s30 = sadd.s32 (!%p203_p5), 3, %s204_s24 }
  0x15   :  { %s56_s29 = sld [smem:[#allocation4 + %s55_s28]] (!%p203_p5) }
  0x16   :  { %s62_s4 = sld [smem:[#allocation4 + %s61_s30]] (!%p203_p5) }
  0x18   :  { %v45_v0 = vstv (!%p203_p5), %s44_s25 }
  0x19   :  { %47 = vst.msk [vmem:[#allocation7] sm:$0xff] %vm46_vm0, %v45_v0  ;;  %48 = vst.msk [vmem:[#allocation7 + $0x8] sm:$0xff] %vm46_vm0, %v45_v0 }
  0x1a   :  { %v51_v1 = vstv %s50_s27 }
  0x1b   :  { %53 = vst.msk [vmem:[#allocation7 + $0x10] sm:$0xff] %vm46_vm0, %v51_v1  ;;  %54 = vst.msk [vmem:[#allocation7 + $0x18] sm:$0xff] %vm46_vm0, %v51_v1  ;;  %v57_v2 = vstv %s56_s29 }
  0x1c   :  { %59 = vst.msk [vmem:[#allocation7 + $0x20] sm:$0xff] %vm46_vm0, %v57_v2  ;;  %60 = vst.msk [vmem:[#allocation7 + $0x28] sm:$0xff] %vm46_vm0, %v57_v2  ;;  %v63_v3 = vstv %s62_s4 }
  0x1d   :  { %65 = vst.msk [vmem:[#allocation7 + $0x30] sm:$0xff] %vm46_vm0, %v63_v3  ;;  %66 = vst.msk [vmem:[#allocation7 + $0x38] sm:$0xff] %vm46_vm0, %v63_v3 }
  0x1e PF:  { %p205_p6 = scmp.eq.s32.totalorder %s406_s0, %s407_s1 }
  0x1f   :  { %v71_v4 = vlaneseq (!%p205_p6)  ;;  %vm123_vm1 = vcmask (!%p205_p6), 130048   ;;  %s135_s11 = sadd.s32 (!%p205_p6), 1, %s407_s1  ;;  %v280_v5 = vmov (!%p205_p6), 0.0   ;;  %v281_v34 = vmov (!%p205_p6), 0  }
  0x20   :  { %70 = sbr.rel (%p205_p6) target bundleno = 89 (0x59), region = 25  ;;  %124 = vst.msk [vmem:[#allocation7] sm:$0xff] (!%p205_p6), %vm123_vm1, %v280_v5  ;;  %125 = vst.msk [vmem:[#allocation7 + $0x8] sm:$0xff] (!%p205_p6), %vm123_vm1, %v280_v5  ;;  %p199_p7 = scmp.ge.s32.totalorder (!%p205_p6), %s406_s0, %s135_s11 }
  0x21   :  { %127 = vst.msk [vmem:[#allocation7 + $0x10] sm:$0xff] (!%p205_p6), %vm123_vm1, %v280_v5  ;;  %128 = vst.msk [vmem:[#allocation7 + $0x18] sm:$0xff] (!%p205_p6), %vm123_vm1, %v280_v5  ;;  %v72_v6 = vshrl.u32 (!%p205_p6), %v71_v4, 7  ;;  %v78_v7 = vand.u32 (!%p205_p6), 127, %v71_v4 }
  0x22   :  { %130 = vst.msk [vmem:[#allocation7 + $0x20] sm:$0xff] (!%p205_p6), %vm123_vm1, %v280_v5  ;;  %131 = vst.msk [vmem:[#allocation7 + $0x28] sm:$0xff] (!%p205_p6), %vm123_vm1, %v280_v5 }
  0x23   :  { %133 = vst.msk [vmem:[#allocation7 + $0x30] sm:$0xff] (!%p205_p6), %vm123_vm1, %v280_v5  ;;  %134 = vst.msk [vmem:[#allocation7 + $0x38] sm:$0xff] (!%p205_p6), %vm123_vm1, %v280_v5  ;;  %v73_v8 = vadd.s32 (!%p205_p6), 8, %v72_v6  ;;  %v81_v9 = vsub.s32 (!%p205_p6), %v72_v6, %v78_v7 }
  0x25   :  { %v82_v10 = vsub.s32 (!%p205_p6), %v73_v8, %v78_v7  ;;  %v87_v11 = vsub.s32 (!%p205_p6), 0, %v81_v9  ;;  %vm83_vm4 = vcmp.lt.s32.totalorder (!%p205_p6), %v81_v9, 0 }
  0x26   :  { %v85_v35 = vsel (!%p205_p6), %vm83_vm4, 16, %v281_v34 }
  0x27   :  { %v206_v12 = vmin.u32 %v87_v11, %v81_v9  ;;  %v89_v13 = vsub.s32 0, %v82_v10  ;;  %vm84_vm5 = vcmp.lt.s32.totalorder %v82_v10, 0 }
  0x28   :  { %v86_v38 = vsel %vm84_vm5, 16, %v281_v34 }
  0x29   :  { %v207_v14 = vmin.u32 %v89_v13, %v82_v10  ;;  %vm93_vm2 = vcmp.gt.s32.totalorder %v206_v12, 1  ;;  %vm91_vm6 = vcmp.lt.s32.totalorder %v206_v12, 8 }
  0x2a   :  { %v94_v15 = vsel %vm93_vm2, %v206_v12, 1 }
  0x2b   :  { %vm95_vm3 = vcmp.gt.s32.totalorder %v207_v14, 1  ;;  %v97_v16 = vcvt.s32.f32 %v94_v15  ;;  %vm92_vm8 = vcmp.lt.s32.totalorder %v207_v14, 8 }
  0x2c   :  { %v96_v17 = vsel %vm95_vm3, %v207_v14, 1 }
  0x2d   :  { %v98_v18 = vcvt.s32.f32 %v96_v17  ;;  %v100_v19 = vmul.f32 0.125, %v97_v16 }
  0x2f   :  { %v101_v20 = vmul.f32 0.125, %v98_v18  ;;  %227 = vlog2.f32 %v100_v19 }
  0x31   :  { %229 = vlog2.f32 %v101_v20 }
  0x39   :  { %v228_v21 = vpop.eup %227 }
  0x3a   :  { %v103_v22 = vmul.f32 0.6931472, %v228_v21 }
  0x3b   :  { %v230_v23 = vpop.eup %229 }
  0x3c   :  { %v105_v24 = vmul.f32 0.6931472, %v230_v23  ;;  %v107_v25 = vmul.f32 0.36067376, %v103_v22 }
  0x3e   :  { %v108_v26 = vmul.f32 0.36067376, %v105_v24  ;;  %v109_v27 = vmul.f32 8.0, %v107_v25 }
  0x40   :  { %v110_v28 = vmul.f32 8.0, %v108_v26  ;;  %v209_v29 = vtrunc.f32 %v109_v27 }
  0x42   :  { %v210_v30 = vcvt.f32.s32 %v209_v29  ;;  %v211_v31 = vtrunc.f32 %v110_v28 }
  0x44   :  { %v212_v32 = vcvt.f32.s32 %v211_v31  ;;  %v113_v33 = vadd.s32 8, %v210_v30 }
  0x45   :  { %200 = sbr.rel (%p199_p7) target bundleno = 89 (0x59), region = 51 }
  0x46   :  { %v114_v36 = vadd.s32 8, %v212_v32  ;;  %vm115_vm7 = vcmp.lt.s32.totalorder %v113_v33, 15 }
  0x47   :  { %v116_v37 = vsel %vm115_vm7, %v113_v33, 15 }
  0x48   :  { %vm117_vm9 = vcmp.lt.s32.totalorder %v114_v36, 15  ;;  %v119_v39 = vsel %vm91_vm6, %v206_v12, %v116_v37 }
  0x49   :  { %v118_v40 = vsel %vm117_vm9, %v114_v36, 15  ;;  %v121_v41 = vadd.s32 %v119_v39, %v85_v35 }
  0x4a   :  { %v120_v42 = vsel %vm92_vm8, %v207_v14, %v118_v40 }
  0x4b   :  { %v122_v43 = vadd.s32 %v120_v42, %v86_v38 }
  0x4c LB: > { %s208_s2 = sshll.u32 %s275_s0, 7  ;;  %v142_v44 = vstv %s275_s0  ;;  %v147_v46 = vld [vmem:[#allocation7] sm:$0xff]  ;;  %v148_v48 = vld [vmem:[#allocation7 + $0x8] sm:$0xff]  ;;  %v156_v49 = vld [vmem:[#allocation7 + $0x10] sm:$0xff]  ;;  %s139_s0 = sadd.s32 1, %s275_s0   ;;  %s275_s0 = sphi %s406_s0, %s139_s0  }
  0x4d   : > { %s146_s20 = sld [smem:[#allocation4 + %s208_s2]]  ;;  %s154_s21 = sadd.s32 1, %s208_s2  ;;  %vm352_vm10 = vcmp.eq.s32.totalorder %v121_v41, %v142_v44  ;;  %vm356_vm11 = vcmp.eq.s32.totalorder %v122_v43, %v142_v44  ;;  %v157_v50 = vld [vmem:[#allocation7 + $0x18] sm:$0xff]  ;;  %v165_v52 = vld [vmem:[#allocation7 + $0x20] sm:$0xff]  ;;  %v166_v53 = vld [vmem:[#allocation7 + $0x28] sm:$0xff] }
  0x4e   : > { %s155_s22 = sld [smem:[#allocation4 + %s154_s21]]  ;;  %s163_s23 = sadd.s32 2, %s208_s2  ;;  %v174_v57 = vld [vmem:[#allocation7 + $0x30] sm:$0xff]  ;;  %v175_v58 = vld [vmem:[#allocation7 + $0x38] sm:$0xff] }
  0x4f   : > { %s164_s24 = sld [smem:[#allocation4 + %s163_s23]]  ;;  %s172_s25 = sadd.s32 3, %s208_s2 }
  0x50   : > { %s173_s26 = sld [smem:[#allocation4 + %s172_s25]]  ;;  %p138_p8 = scmp.ge.s32.totalorder %s139_s0, %s135_s11 }
  0x52   :  { %141 = sbr.rel (!%p138_p8) target bundleno = 76 (0x4c), region = 57 }
  0x53   : > { %v149_v51 = vstv %s146_s20 }
  0x54   : > { %v150_v54 = vsel %vm352_vm10, %v149_v51, %v147_v46  ;;  %v151_v55 = vsel %vm356_vm11, %v149_v51, %v148_v48  ;;  %v158_v56 = vstv %s155_s22 }
  0x55   : > { %152 = vst.msk [vmem:[#allocation7] sm:$0xff] %vm123_vm1, %v150_v54  ;;  %153 = vst.msk [vmem:[#allocation7 + $0x8] sm:$0xff] %vm123_vm1, %v151_v55  ;;  %v159_v59 = vsel %vm352_vm10, %v158_v56, %v156_v49  ;;  %v160_v60 = vsel %vm356_vm11, %v158_v56, %v157_v50  ;;  %v167_v61 = vstv %s164_s24 }
  0x56   : > { %161 = vst.msk [vmem:[#allocation7 + $0x10] sm:$0xff] %vm123_vm1, %v159_v59  ;;  %162 = vst.msk [vmem:[#allocation7 + $0x18] sm:$0xff] %vm123_vm1, %v160_v60  ;;  %v168_v62 = vsel %vm352_vm10, %v167_v61, %v165_v52  ;;  %v169_v63 = vsel %vm356_vm11, %v167_v61, %v166_v53  ;;  %v176_v0 = vstv %s173_s26 }
  0x57   : > { %170 = vst.msk [vmem:[#allocation7 + $0x20] sm:$0xff] %vm123_vm1, %v168_v62  ;;  %171 = vst.msk [vmem:[#allocation7 + $0x28] sm:$0xff] %vm123_vm1, %v169_v63  ;;  %v177_v1 = vsel %vm352_vm10, %v176_v0, %v174_v57  ;;  %v178_v2 = vsel %vm356_vm11, %v176_v0, %v175_v58 }
  0x58   : > { %179 = vst.msk [vmem:[#allocation7 + $0x30] sm:$0xff] %vm123_vm1, %v177_v1  ;;  %180 = vst.msk [vmem:[#allocation7 + $0x38] sm:$0xff] %vm123_vm1, %v178_v2 }
  0x59 PF:  { %s282_s29 = smov [#allocation7]  }
  0x5a   :  { %s186_s30 = sshll.u32 %s282_s29, 4  ;;  %s187_s30 = int_to_ptr.vmem [resolvable:$true] %s186_s30 }
  0x5b   :  { %s243_s4 = scalar_lea.vmem %s187_s30, 1024  ;;  %p248_p10 = scmp.lt.s32.totalorder %s187_s30, %s187_s30 }
  0x5c   :  { %p244_p9 = scmp.ne.s32.totalorder %s187_s30, %s243_s4  ;;  %p249_p11 = scmp.lt.s32.totalorder %s243_s4, %s243_s4 }
  0x5e   :  { %p250_p12 = por %p249_p11, %p248_p10 }
  0x60   :  { %p251_p13 = pnand %p250_p12, %p244_p9 }
  0x62   :  { %254 = shalt.err (!%p251_p13)
}
  0x63   :  { %s255_s7 = scalar_lea.hbm %s409_s3, 1024 }
  0x64   :  { %p256_p0 = scmp.ne.s32.totalorder %s409_s3, %s255_s7  ;;  %p259_p1 = scmp.lt.u32.totalorder %s255_s7, %s409_s3 }
  0x66   :  { %p261_p2 = pnand %p259_p1, %p256_p0 }
  0x68   :  { %264 = shalt.err (!%p261_p2)
}
  0x69   :  { %192 = dma.vmem_to_hbm [thread:$0]  %s187_s30, 1024, %s409_s3, [#allocation5], %s278_s17, %s278_s17, %s279_s18  }
  0x6a   :  { %271 = dma.done.wait [#allocation5], 1024  }
  0x6b   :  { %272 = vsyncadd [#allocation5], 4294966272 }
  0x6c   :  { %196 = vsyncpa [#allocation5], 1 }
  0x6d   :  { %197 = vsyncpa [#allocation6], 1 }

</bundles_post_ra>
